<compile_context>
chip_gen: v7x
topology: tpu7x:2x2x1
jax: 0.10.0
libtpu: 0.0.40
codegen_flags: <defaults>
</compile_context>

<pallas_src>
import functools

import jax
import jax.numpy as jnp
from jax import lax
from jax.experimental import pallas as pl
from jax.experimental.pallas import tpu as pltpu


def _round_up(x, m):
    return ((x + m - 1) // m) * m


def _sublane_align(dtype):
    # Packing sublane: f32 -> 8, bf16 -> 16, int8/fp8 -> 32.
    return 8 * max(1, 4 // jnp.dtype(dtype).itemsize)


def _choose_tile(length, target, align):
    """Tile that is either the (padded) full length or an MXU-aligned tile."""
    if length <= target:
        return _round_up(length, align)
    step = max(align, 128)
    return max((target // step) * step, step)


def _default_vmem_limit_bytes():
    cap = None
    try:
        cap = int(pltpu.get_tpu_info().vmem_capacity_bytes)
    except Exception:
        cap = None
    if not cap:
        cap = 64 * 1024 * 1024  # assume the smallest generation (v7x per-core)
    # ~3/4 of physical keeps headroom for double-buffering; 96 MiB on v5e/v6e,
    # 48 MiB on v7x.
    return min((3 * cap) // 4, 96 * 1024 * 1024)


def _sdpa_flash_kernel(q_ref, k_ref, v_ref, o_ref, m_ref, l_ref, acc_ref, *,
                       inv_temperature, compute_dtype, kv_len, tk, mask_kv):
    ki = pl.program_id(2)

    @pl.when(ki == 0)
    def _():
        m_ref[...] = jnp.full_like(m_ref, -jnp.inf)
        l_ref[...] = jnp.zeros_like(l_ref)
        acc_ref[...] = jnp.zeros_like(acc_ref)

    # Fold 1/temperature into q (the small operand) instead of dividing the
    # (tq, tk) score tile; cast MXU operands to the compute dtype (bf16 fast
    # path when inputs are f32 and allowed).
    q = (q_ref[0] * jnp.asarray(inv_temperature, q_ref.dtype)).astype(compute_dtype)
    k = k_ref[0].astype(compute_dtype)

    # q @ k^T as a contraction over the last dims of both -> no materialized
    # transpose (no XLU pass); f32 accumulation.
    s = jnp.einsum("qd,kd->qk", q, k, preferred_element_type=jnp.float32,
                   precision=lax.Precision.HIGHEST)

    if mask_kv:  # compile-time flag: the key axis was padded; mask pad columns
        col = ki * tk + lax.broadcasted_iota(jnp.int32, s.shape, 1)
        s = jnp.where(col < kv_len, s, -jnp.inf)

    # TODO(synk): optional boolean `mask` argument (masked_fill(-inf)) of the
    # PyTorch module is not wired in; only the mask=None path is implemented.

    # Online (streaming) softmax over the key axis with f32 accumulators.
    m_prev = m_ref[...]
    m_new = jnp.maximum(m_prev, jnp.max(s, axis=-1, keepdims=True))
    alpha = jnp.exp(m_prev - m_new)
    p = jnp.exp(s - m_new)
    l_ref[...] = alpha * l_ref[...] + jnp.sum(p, axis=-1, keepdims=True)
    acc_ref[...] = alpha * acc_ref[...] + jnp.einsum(
        "qk,kd->qd", p.astype(compute_dtype), v_ref[0].astype(compute_dtype),
        preferred_element_type=jnp.float32, precision=lax.Precision.HIGHEST)
    m_ref[...] = m_new

    @pl.when(ki == pl.num_programs(2) - 1)
    def _():
        # Exact normalization: runs once per q tile over (tq, Dv); the approx
        # EUP reciprocal saved nothing here but cost accuracy.
        o_ref[0] = (acc_ref[...] / l_ref[...]).astype(o_ref.dtype)


def scaled_dot_product_attention(q, k, v, temperature, *, mask=None,
                                 use_bf16_matmul=True,
                                 tq_target=256, tk_target=512,
                                 vmem_limit_bytes=None):
    """q: (B, Lq, D), k: (B, Lk, D), v: (B, Lk, Dv) -> (B, Lq, Dv)."""
    if mask is not None:
        # TODO(synk): boolean mask path (masked_fill with -inf) not implemented.
        raise NotImplementedError("only the mask=None forward path is supported")

    B, Lq, D = q.shape
    _, Lk, _ = k.shape
    Dv = v.shape[-1]

    align = _sublane_align(q.dtype)
    tq = _choose_tile(Lq, tq_target, align)
    tk = _choose_tile(Lk, tk_target, align)

    padded_lq = _round_up(Lq, tq)
    padded_lk = _round_up(Lk, tk)
    if padded_lq != Lq:
        q = jnp.pad(q, ((0, 0), (0, padded_lq - Lq), (0, 0)))
    if padded_lk != Lk:
        k = jnp.pad(k, ((0, 0), (0, padded_lk - Lk), (0, 0)))
        v = jnp.pad(v, ((0, 0), (0, padded_lk - Lk), (0, 0)))

    grid = (B, padded_lq // tq, padded_lk // tk)

    if use_bf16_matmul and q.dtype == jnp.float32:
        compute_dtype = jnp.bfloat16
    else:
        compute_dtype = q.dtype

    if vmem_limit_bytes is None:
        vmem_limit_bytes = _default_vmem_limit_bytes()

    kernel = functools.partial(
        _sdpa_flash_kernel,
        inv_temperature=1.0 / float(temperature),
        compute_dtype=compute_dtype,
        kv_len=Lk, tk=tk, mask_kv=(padded_lk != Lk))

    out = pl.pallas_call(
        kernel,
        out_shape=jax.ShapeDtypeStruct((B, padded_lq, Dv), q.dtype),
        grid_spec=pltpu.PrefetchScalarGridSpec(
            num_scalar_prefetch=0,
            grid=grid,
            in_specs=[
                pl.BlockSpec((1, tq, D), lambda b, qi, ki: (b, qi, 0)),
                pl.BlockSpec((1, tk, D), lambda b, qi, ki: (b, ki, 0)),
                pl.BlockSpec((1, tk, Dv), lambda b, qi, ki: (b, ki, 0)),
            ],
            out_specs=pl.BlockSpec((1, tq, Dv), lambda b, qi, ki: (b, qi, 0)),
            scratch_shapes=[
                pltpu.VMEM((tq, 1), jnp.float32),    # running max m
                pltpu.VMEM((tq, 1), jnp.float32),    # running denom l
                pltpu.VMEM((tq, Dv), jnp.float32),   # output accumulator
            ],
        ),
        compiler_params=pltpu.CompilerParams(
            dimension_semantics=("parallel", "parallel", "arbitrary"),
            vmem_limit_bytes=vmem_limit_bytes,
        ),
    )(q, k, v)

    if padded_lq != Lq:
        out = out[:, :Lq, :]
    return out


def _reference(q, k, v, temperature):
    scores = jnp.einsum("bqd,bkd->bqk", q, k,
                        precision=lax.Precision.HIGHEST) / temperature
    attn = jax.nn.softmax(scores, axis=2)
    return jnp.einsum("bqk,bkd->bqd", attn, v, precision=lax.Precision.HIGHEST)


if __name__ == "__main__":
    # Case 1: small module-consistent shapes, f32-exact MXU path, tight check.
    B, Lq, Lk, D, Dv = 2, 8, 8, 32, 32
    temperature = float(D) ** 0.5

    kq, kk, kv = jax.random.split(jax.random.PRNGKey(0), 3)
    q = jax.random.normal(kq, (B, Lq, D), dtype=jnp.float32)
    k = jax.random.normal(kk, (B, Lk, D), dtype=jnp.float32)
    v = jax.random.normal(kv, (B, Lk, Dv), dtype=jnp.float32)

    ref = _reference(q, k, v, temperature)

    out_f32 = jax.block_until_ready(
        scaled_dot_product_attention(q, k, v, temperature, use_bf16_matmul=False))
    assert out_f32.shape == (B, Lq, Dv)
    err = float(jnp.max(jnp.abs(out_f32 - ref)))
    assert jnp.allclose(out_f32, ref, atol=1e-4, rtol=1e-4), (
        f"f32 path mismatch vs reference (max abs err {err})")

    # Case 2: default bf16-MXU fast path (f32 accumulation) -- looser tolerance.
    out_bf16 = jax.block_until_ready(
        scaled_dot_product_attention(q, k, v, temperature))
    err = float(jnp.max(jnp.abs(out_bf16 - ref)))
    assert jnp.allclose(out_bf16, ref, atol=2e-2, rtol=2e-2), (
        f"bf16 path mismatch vs reference (max abs err {err})")

    # Case 3: awkward lengths exercise padding + in-kernel key masking.
    B2, Lq2, Lk2 = 2, 20, 35
    kq2, kk2, kv2 = jax.random.split(jax.random.PRNGKey(1), 3)
    q2 = jax.random.normal(kq2, (B2, Lq2, D), dtype=jnp.float32)
    k2 = jax.random.normal(kk2, (B2, Lk2, D), dtype=jnp.float32)
    v2 = jax.random.normal(kv2, (B2, Lk2, Dv), dtype=jnp.float32)
    out2 = jax.block_until_ready(
        scaled_dot_product_attention(q2, k2, v2, temperature,
                                     use_bf16_matmul=False))
    ref2 = _reference(q2, k2, v2, temperature)
    err = float(jnp.max(jnp.abs(out2 - ref2)))
    assert out2.shape == (B2, Lq2, Dv)
    assert jnp.allclose(out2, ref2, atol=1e-4, rtol=1e-4), (
        f"padded/masked path mismatch vs reference (max abs err {err})")

    print("KERNEL_OK")
</pallas_src>

<mosaic_0001>
module attributes {stable_mosaic.version = 11 : i64} {
  func.func @_sdpa_flash_kernel(%arg0: i32, %arg1: i32, %arg2: i32, %arg3: memref<1x8x32xf32, #tpu.memory_space<vmem>>, %arg4: memref<1x8x32xf32, #tpu.memory_space<vmem>>, %arg5: memref<1x8x32xf32, #tpu.memory_space<vmem>>, %arg6: memref<1x8x32xf32, #tpu.memory_space<vmem>>, %arg7: memref<8x1xf32, #tpu.memory_space<vmem>>, %arg8: memref<8x1xf32, #tpu.memory_space<vmem>>, %arg9: memref<8x32xf32, #tpu.memory_space<vmem>>) attributes {dimension_semantics = [#tpu.dimension_semantics<parallel>, #tpu.dimension_semantics<parallel>, #tpu.dimension_semantics<arbitrary>], iteration_bounds = array<i64: 2, 1, 1>, scalar_prefetch = 0 : i64, scratch_operands = 3 : i64, tpu.core_type = #tpu.core_type<tc>, window_params = [{transform_indices = @transform_0, window_bounds = array<i64: 1, 8, 32>}, {transform_indices = @transform_1, window_bounds = array<i64: 1, 8, 32>}, {transform_indices = @transform_2, window_bounds = array<i64: 1, 8, 32>}, {transform_indices = @transform_3, window_bounds = array<i64: 1, 8, 32>}]} {
    %c0_i32 = arith.constant 0 : i32
    %0 = arith.cmpi eq, %arg2, %c0_i32 : i32
    %1 = arith.extui %0 : i1 to i32
    %c0_i32_0 = arith.constant 0 : i32
    %2 = arith.cmpi ne, %1, %c0_i32_0 : i32
    scf.if %2 {
      %cst_27 = arith.constant 0xFF800000 : f32
      %37 = vector.broadcast %cst_27 : f32 to vector<8x1xf32>
      %c0_28 = arith.constant 0 : index
      %c0_29 = arith.constant 0 : index
      %38 = vector.load %arg7[%c0_28, %c0_29] : memref<8x1xf32, #tpu.memory_space<vmem>>, vector<8x1xf32>
      tpu.vector_store %arg7[%c0_28, %c0_29], %37 {strides = array<i32>} : memref<8x1xf32, #tpu.memory_space<vmem>>, vector<8x1xf32>,
      %cst_30 = arith.constant 0.000000e+00 : f32
      %39 = vector.broadcast %cst_30 : f32 to vector<8x1xf32>
      %c0_31 = arith.constant 0 : index
      %c0_32 = arith.constant 0 : index
      %40 = vector.load %arg8[%c0_31, %c0_32] : memref<8x1xf32, #tpu.memory_space<vmem>>, vector<8x1xf32>
      tpu.vector_store %arg8[%c0_31, %c0_32], %39 {strides = array<i32>} : memref<8x1xf32, #tpu.memory_space<vmem>>, vector<8x1xf32>,
      %cst_33 = arith.constant 0.000000e+00 : f32
      %41 = vector.broadcast %cst_33 : f32 to vector<8x32xf32>
      %c0_34 = arith.constant 0 : index
      %c0_35 = arith.constant 0 : index
      %42 = vector.load %arg9[%c0_34, %c0_35] : memref<8x32xf32, #tpu.memory_space<vmem>>, vector<8x32xf32>
      tpu.vector_store %arg9[%c0_34, %c0_35], %41 {strides = array<i32>} : memref<8x32xf32, #tpu.memory_space<vmem>>, vector<8x32xf32>,
    } else {
    }
    %c0 = arith.constant 0 : index
    %c0_1 = arith.constant 0 : index
    %c0_2 = arith.constant 0 : index
    %3 = vector.load %arg3[%c0, %c0_1, %c0_2] : memref<1x8x32xf32, #tpu.memory_space<vmem>>, vector<1x8x32xf32>
    %4 = vector.shape_cast %3 : vector<1x8x32xf32> to vector<8x32xf32>
    %cst = arith.constant 0.176776692 : f32
    %5 = vector.broadcast %cst : f32 to vector<8x32xf32>
    %6 = arith.mulf %4, %5 : vector<8x32xf32>
    %c0_3 = arith.constant 0 : index
    %c0_4 = arith.constant 0 : index
    %c0_5 = arith.constant 0 : index
    %7 = vector.load %arg4[%c0_3, %c0_4, %c0_5] : memref<1x8x32xf32, #tpu.memory_space<vmem>>, vector<1x8x32xf32>
    %8 = vector.shape_cast %7 : vector<1x8x32xf32> to vector<8x32xf32>
    "tpu.trace_start"() <{level = 10 : i32, message = "qd,kd->qk"}> : () -> ()
    %cst_6 = arith.constant dense<0.000000e+00> : vector<8x8xf32>
    %9 = tpu.matmul %6, %8, %cst_6 {dimension_numbers = #tpu.dot_dimension_numbers<[1], [1], [0], [0], [0, 0, 1, 0], [], []>, precision = #tpu.contract_precision<fp32>} : vector<8x32xf32>, vector<8x32xf32>, vector<8x8xf32> -> vector<8x8xf32>
    "tpu.trace_stop"() : () -> ()
    %c0_7 = arith.constant 0 : index
    %c0_8 = arith.constant 0 : index
    %10 = vector.load %arg7[%c0_7, %c0_8] : memref<8x1xf32, #tpu.memory_space<vmem>>, vector<8x1xf32>
    %cst_9 = arith.constant dense<0xFF800000> : vector<8xf32>
    %11 = vector.multi_reduction <maximumf>, %9, %cst_9 [1] : vector<8x8xf32> to vector<8xf32>
    %12 = vector.shape_cast %11 : vector<8xf32> to vector<8x1xf32>
    %13 = arith.maximumf %10, %12 : vector<8x1xf32>
    %14 = arith.subf %10, %13 : vector<8x1xf32>
    %15 = math.exp %14 : vector<8x1xf32>
    %16 = vector.broadcast %13 : vector<8x1xf32> to vector<8x8xf32>
    %17 = arith.subf %9, %16 : vector<8x8xf32>
    %18 = math.exp %17 : vector<8x8xf32>
    %c0_10 = arith.constant 0 : index
    %c0_11 = arith.constant 0 : index
    %19 = vector.load %arg8[%c0_10, %c0_11] : memref<8x1xf32, #tpu.memory_space<vmem>>, vector<8x1xf32>
    %20 = arith.mulf %15, %19 : vector<8x1xf32>
    %cst_12 = arith.constant dense<0.000000e+00> : vector<8xf32>
    %21 = vector.multi_reduction <add>, %18, %cst_12 [1] : vector<8x8xf32> to vector<8xf32>
    %22 = vector.shape_cast %21 : vector<8xf32> to vector<8x1xf32>
    %23 = arith.addf %20, %22 : vector<8x1xf32>
    %c0_13 = arith.constant 0 : index
    %c0_14 = arith.constant 0 : index
    %24 = vector.load %arg8[%c0_13, %c0_14] : memref<8x1xf32, #tpu.memory_space<vmem>>, vector<8x1xf32>
    tpu.vector_store %arg8[%c0_13, %c0_14], %23 {strides = array<i32>} : memref<8x1xf32, #tpu.memory_space<vmem>>, vector<8x1xf32>,
    %c0_15 = arith.constant 0 : index
    %c0_16 = arith.constant 0 : index
    %25 = vector.load %arg9[%c0_15, %c0_16] : memref<8x32xf32, #tpu.memory_space<vmem>>, vector<8x32xf32>
    %26 = vector.broadcast %15 : vector<8x1xf32> to vector<8x32xf32>
    %27 = arith.mulf %26, %25 : vector<8x32xf32>
    %c0_17 = arith.constant 0 : index
    %c0_18 = arith.constant 0 : index
    %c0_19 = arith.constant 0 : index
    %28 = vector.load %arg5[%c0_17, %c0_18, %c0_19] : memref<1x8x32xf32, #tpu.memory_space<vmem>>, vector<1x8x32xf32>
    %29 = vector.shape_cast %28 : vector<1x8x32xf32> to vector<8x32xf32>
    "tpu.trace_start"() <{level = 10 : i32, message = "qk,kd->qd"}> : () -> ()
    %cst_20 = arith.constant dense<0.000000e+00> : vector<8x32xf32>
    %30 = tpu.matmul %18, %29, %cst_20 {dimension_numbers = #tpu.dot_dimension_numbers<[1], [0], [0], [1], [0, 0, 1, 1], [], []>, precision = #tpu.contract_precision<fp32>} : vector<8x8xf32>, vector<8x32xf32>, vector<8x32xf32> -> vector<8x32xf32>
    "tpu.trace_stop"() : () -> ()
    %31 = arith.addf %27, %30 : vector<8x32xf32>
    %c0_21 = arith.constant 0 : index
    %c0_22 = arith.constant 0 : index
    %32 = vector.load %arg9[%c0_21, %c0_22] : memref<8x32xf32, #tpu.memory_space<vmem>>, vector<8x32xf32>
    tpu.vector_store %arg9[%c0_21, %c0_22], %31 {strides = array<i32>} : memref<8x32xf32, #tpu.memory_space<vmem>>, vector<8x32xf32>,
    %c0_23 = arith.constant 0 : index
    %c0_24 = arith.constant 0 : index
    %33 = vector.load %arg7[%c0_23, %c0_24] : memref<8x1xf32, #tpu.memory_space<vmem>>, vector<8x1xf32>
    tpu.vector_store %arg7[%c0_23, %c0_24], %13 {strides = array<i32>} : memref<8x1xf32, #tpu.memory_space<vmem>>, vector<8x1xf32>,
    %c0_i32_25 = arith.constant 0 : i32
    %34 = arith.cmpi eq, %arg2, %c0_i32_25 : i32
    %35 = arith.extui %34 : i1 to i32
    %c0_i32_26 = arith.constant 0 : i32
    %36 = arith.cmpi ne, %35, %c0_i32_26 : i32
    scf.if %36 {
      %c0_27 = arith.constant 0 : index
      %c0_28 = arith.constant 0 : index
      %37 = vector.load %arg9[%c0_27, %c0_28] : memref<8x32xf32, #tpu.memory_space<vmem>>, vector<8x32xf32>
      %c0_29 = arith.constant 0 : index
      %c0_30 = arith.constant 0 : index
      %38 = vector.load %arg8[%c0_29, %c0_30] : memref<8x1xf32, #tpu.memory_space<vmem>>, vector<8x1xf32>
      %39 = vector.broadcast %38 : vector<8x1xf32> to vector<8x32xf32>
      %40 = arith.divf %37, %39 : vector<8x32xf32>
      %c0_31 = arith.constant 0 : index
      %c0_32 = arith.constant 0 : index
      %c0_33 = arith.constant 0 : index
      %41 = vector.load %arg6[%c0_31, %c0_32, %c0_33] : memref<1x8x32xf32, #tpu.memory_space<vmem>>, vector<1x8x32xf32>
      %42 = vector.shape_cast %41 : vector<1x8x32xf32> to vector<8x32xf32>
      %43 = vector.shape_cast %40 : vector<8x32xf32> to vector<1x8x32xf32>
      tpu.vector_store %arg6[%c0_31, %c0_32, %c0_33], %43 {strides = array<i32>} : memref<1x8x32xf32, #tpu.memory_space<vmem>>, vector<1x8x32xf32>,
    } else {
    }
    return
  }
  func.func @transform_0(%arg0: i32, %arg1: i32, %arg2: i32) -> (i32, i32, i32) {
    %c0_i32 = arith.constant 0 : i32
    %c0_i32_0 = arith.constant 0 : i32
    return %arg0, %arg1, %c0_i32 : i32, i32, i32
  }
  func.func @transform_1(%arg0: i32, %arg1: i32, %arg2: i32) -> (i32, i32, i32) {
    %c0_i32 = arith.constant 0 : i32
    %c0_i32_0 = arith.constant 0 : i32
    return %arg0, %arg2, %c0_i32 : i32, i32, i32
  }
  func.func @transform_2(%arg0: i32, %arg1: i32, %arg2: i32) -> (i32, i32, i32) {
    %c0_i32 = arith.constant 0 : i32
    %c0_i32_0 = arith.constant 0 : i32
    return %arg0, %arg2, %c0_i32 : i32, i32, i32
  }
  func.func @transform_3(%arg0: i32, %arg1: i32, %arg2: i32) -> (i32, i32, i32) {
    %c0_i32 = arith.constant 0 : i32
    %c0_i32_0 = arith.constant 0 : i32
    return %arg0, %arg1, %c0_i32 : i32, i32, i32
  }
}

</mosaic_0001>

<bundles_post_ra>
// kernel: tpu_custom_call.1
= control target key start
LH: loop header
LB: loop body
LE: loop exit
PB: predicated region body
PF: predicated region fallthrough
CT: control target
= control target key end

     0   :  { %s2110_s0 = inlined_call_operand.hbm [shape: f32[2,8,32], index: 0, kind: input, shape index: {}]   ;;  %s2111_s1 = inlined_call_operand.hbm [shape: f32[2,8,32], index: 1, kind: input, shape index: {}]   ;;  %s2112_s2 = inlined_call_operand.hbm [shape: f32[2,8,32], index: 2, kind: input, shape index: {}]   ;;  %s2113_s3 = inlined_call_operand.hbm [shape: f32[2,8,32], index: 3, kind: output, shape index: {}]  }
   0x1   :  { %2119 = sst [smem:[#allocation18_spill]] %s2111_s1 }
   0x2   :  { %8 = vsyncpa [#allocation6], 0 }
   0x3   :  { %10 = vsyncpa [#allocation6 + $0x1], 0 }
   0x4   :  { %11 = vsyncpa [#allocation9], 0 }
   0x5   :  { %13 = vsyncpa [#allocation9 + $0x1], 0 }
   0x6   :  { %14 = vsyncpa [#allocation7], 0 }
   0x7   :  { %16 = vsyncpa [#allocation7 + $0x1], 0  ;;  %s1796_s12 = smov 0   ;;  %s1798_s13 = smov 0  }
   0x8   :  { %s1800_s14 = smov 0   ;;  %s1802_s15 = smov 0  }
   0x9   :  { %s1804_s16 = smov 0   ;;  %s1806_s17 = smov 0  }
   0xa LB: > { %2120 = sst [smem:[#allocation15_spill]] %s1762_s16  ;;  %s1827_s18 = sadd.s32 4294967295, %s1766_s17   ;;  %s1766_s17 = sphi %s1806_s17, %s22_s17   ;;  %s1762_s16 = sphi %s1804_s16, %s2141_s16   ;;  %s1758_s15 = sphi %s1802_s15, %s2140_s15   ;;  %s1754_s14 = sphi %s1800_s14, %s2144_s14   ;;  %s1750_s13 = sphi %s1798_s13, %s2143_s13   ;;  %s1746_s12 = sphi %s1796_s12, %s2142_s12  }
   0xb   : > { %s1394_s19 = sadd.s32 4294967294, %s1766_s17   ;;  %s41_s20 = sadd.s32 1, %s1762_s16 }
   0xc   : > { %s50_s21 = sadd.s32 1, %s1754_s14  ;;  %p43_p0 = scmp.ge.s32.totalorder %s41_s20, 2 }
   0xd   : > { %p57_p1 = scmp.ne.s32.totalorder %s1754_s14, %s1750_s13  ;;  %p58_p2 = scmp.eq.s32.totalorder %s1766_s17, 0 }
   0xe   : > { %p63_p3 = scmp.ne.s32.totalorder %s1750_s13, %s1746_s12  ;;  %s2146_s20 = smov (%p43_p0, %s41_s20), 0 }
   0xf   : > { %2121 = sst [smem:[#allocation16_spill]] %s2146_s20  ;;  %p1839_p4 = por %p58_p2, %p57_p1 }
  0x10   : > { %p64_p5 = scmp.eq.s32.totalorder %s1827_s18, 0  ;;  %s45_s23 = ssub.s32 %s1762_s16, %s2146_s20 }
  0x11   : > { %p145_p6 = scmp.eq.s32.totalorder %s1827_s18, 1  ;;  %p48_p7 = scmp.eq.s32.totalorder %s45_s23, 0 }
  0x12   : > { %p1847_p8 = por %p64_p5, %p63_p3  ;;  %p151_p10 = scmp.eq.s32.totalorder %s1394_s19, 1 }
  0x13   : > { %p1851_p9 = por %p145_p6, %p57_p1  ;;  %p1528_p13 = scmp.lt.s32.totalorder %s1766_s17, 2 }
  0x14   : > { %s2123_s24 = scalar_select %p1847_p8, 1, 0 }
  0x15   : > { %s2124_s25 = scalar_select %p1851_p9, 1, 0 }
  0x16   : > { %s1856_s26 = scalar_select %p48_p7, %s1754_s14, %s50_s21  }
  0x17   : > { %p1858_p11 = por %p151_p10, %p63_p3  ;;  %s171_s28 = sand.u32 1, %s1754_s14  }
  0x18   : > { %2125 = sst [smem:[#allocation17_spill]] %s1856_s26  ;;  %s1867_s29 = sshll.u32 %s171_s28, 3 }
  0x19   : > { %s2126_s27 = scalar_select %p1858_p11, 1, 0 }
  0x1a   : > { %s1870_s30 = sshll.u32 %s1762_s16, 7  ;;  %p1874_p0 = pnand %p1528_p13, %p1839_p4 }
  0x1b   : > { %s190_s5 = sand.u32 1, %s1766_s17   ;;  %s2128_s1 = sld [smem:[#allocation18_spill]] }
  0x1c   : > { %s2127_s4 = scalar_select %p1874_p0, 1, 0 }
  0x1d   : > { %s194_s9 = scalar_lea.vmem [#allocation8], %s1867_s29  ;;  %s1890_s11 = scalar_lea.sflag [#allocation9], %s190_s5 }
  0x1e   : > { %s202_s10 = sshll.u32 %s194_s9, 4  ;;  %p1896_p4 = pneg %p1874_p0  ;;  %s1887_s10 = int_to_ptr.vmem [resolvable:$true] %s202_s10 }
  0x21   : > { %s1883_s8 = scalar_lea.hbm %s2128_s1, %s1870_s30  ;;  %s1595_s6 = scalar_lea.hbm %s2128_s1, 256 }
  0x22   : > { %s1590_s19 = scalar_lea.hbm %s1883_s8, 128  ;;  %p1596_p7 = scmp.lt.u32.totalorder %s1883_s8, %s2128_s1 }
  0x23   : > { %p1591_p3 = scmp.ne.s32.totalorder %s1883_s8, %s1590_s19  ;;  %p1597_p10 = scmp.lt.u32.totalorder %s1595_s6, %s1590_s19 }
  0x24   : > { %p1599_p12 = scmp.lt.u32.totalorder %s1590_s19, %s1883_s8 }
  0x25   : > { %p1593_p5 = pnand %p1896_p4, %p1591_p3  ;;  %p1598_p13 = por %p1597_p10, %p1596_p7 }
  0x27   : > { %p1594_p6 = pneg %p1593_p5  ;;  %p1600_p1 = por %p1599_p12, %p1598_p13 }
  0x29   : > { %p1601_p2 = pnand %p1600_p1, %p1594_p6 }
  0x2b   : > { %1604 = shalt.err (!%p1601_p2)
}
  0x2c   : > { %s1605_s5 = scalar_lea.vmem %s1887_s10, 128  ;;  %s1768_s22 = smov [#allocation8]  }
  0x2d   : > { %p1606_p3 = scmp.ne.s32.totalorder %s1887_s10, %s1605_s5  ;;  %s1610_s23 = sshll.u32 %s1768_s22, 4  ;;  %s1611_s23 = int_to_ptr.vmem [resolvable:$false] %s1610_s23 }
  0x2e   : > { %s1612_s7 = scalar_lea.vmem %s1611_s23, 256  ;;  %p1613_p9 = scmp.lt.s32.totalorder %s1887_s10, %s1611_s23 }
  0x2f   : > { %p1608_p5 = pnand %p1606_p3, %p1896_p4  ;;  %p1614_p8 = scmp.lt.s32.totalorder %s1612_s7, %s1605_s5 }
  0x31   : > { %p1609_p11 = pneg %p1608_p5  ;;  %p1615_p7 = por %p1614_p8, %p1613_p9 }
  0x33   : > { %p1616_p10 = pnand %p1615_p7, %p1609_p11 }
  0x35   : > { %1619 = shalt.err (!%p1616_p10)
}
  0x36   : > { %1520 = dma.hbm_to_vmem [thread:$0]  (!%p1874_p0), %s1883_s8, 128, %s1887_s10, %s1890_s11  }
  0x37   : > { %p2130_p12 = scmp.lt.s32.totalorder %s1766_s17, 3  ;;  %p2131_p1 = scmp.ge.s32.totalorder %s1766_s17, 1 }
  0x38   : > { %s1932_s5 = scalar_lea.hbm %s2110_s0, %s1870_s30  ;;  %s175_s22 = scalar_lea.vmem [#allocation5], %s1867_s29 }
  0x39   : > { %p1924_p2 = pnand %p2131_p1, %p2130_p12  ;;  %s183_s23 = sshll.u32 %s175_s22, 4  ;;  %s1935_s23 = int_to_ptr.vmem [resolvable:$true] %s183_s23 }
  0x3a   : > { %s1941_s7 = scalar_lea.hbm %s2112_s2, %s1870_s30  ;;  %s172_s1 = scalar_lea.sflag [#allocation6], %s171_s28 }
  0x3b   : > { %s2132_s19 = scalar_select %p1924_p2, 1, 0 }
  0x3c   : > { %s1620_s20 = scalar_lea.hbm %s1932_s5, 128  ;;  %s1625_s16 = scalar_lea.hbm %s2110_s0, 256 }
  0x3d   : > { %p1621_p8 = scmp.ne.s32.totalorder %s1932_s5, %s1620_s20  ;;  %p1626_p6 = scmp.lt.u32.totalorder %s1932_s5, %s2110_s0 }
  0x3e   : > { %p1627_p13 = scmp.lt.u32.totalorder %s1625_s16, %s1620_s20  ;;  %p1629_p5 = scmp.lt.u32.totalorder %s1620_s20, %s1932_s5 }
  0x3f   : > { %p1623_p9 = pnand %p1621_p8, %p1896_p4 }
  0x40   : > { %p1628_p3 = por %p1627_p13, %p1626_p6 }
  0x41   : > { %p1624_p11 = pneg %p1623_p9 }
  0x42   : > { %p1630_p7 = por %p1629_p5, %p1628_p3 }
  0x44   : > { %p1631_p10 = pnand %p1630_p7, %p1624_p11 }
  0x46   : > { %1634 = shalt.err (!%p1631_p10)
}
  0x47   : > { %s1635_s28 = scalar_lea.vmem %s1935_s23, 128  ;;  %s1769_s30 = smov [#allocation5]  }
  0x48   : > { %p1636_p12 = scmp.ne.s32.totalorder %s1935_s23, %s1635_s28  ;;  %s1640_s8 = sshll.u32 %s1769_s30, 4  ;;  %s1641_s8 = int_to_ptr.vmem [resolvable:$false] %s1640_s8 }
  0x49   : > { %s1642_s26 = scalar_lea.vmem %s1641_s8, 256  ;;  %p1643_p9 = scmp.lt.s32.totalorder %s1935_s23, %s1641_s8 }
  0x4a   : > { %p1638_p1 = pnand %p1636_p12, %p1896_p4  ;;  %p1644_p2 = scmp.lt.s32.totalorder %s1642_s26, %s1635_s28 }
  0x4c   : > { %p1639_p8 = pneg %p1638_p1  ;;  %p1645_p6 = por %p1644_p2, %p1643_p9 }
  0x4e   : > { %p1646_p13 = pnand %p1645_p6, %p1639_p8 }
  0x50   : > { %1649 = shalt.err (!%p1646_p13)
}
  0x51   : > { %1517 = dma.hbm_to_vmem [thread:$0]  (!%p1874_p0), %s1932_s5, 128, %s1935_s23, %s172_s1  }
  0x52   : > { %s213_s16 = scalar_lea.vmem [#allocation10], %s1867_s29  ;;  %s1650_s10 = scalar_lea.hbm %s1941_s7, 128 }
  0x53   : > { %s221_s20 = sshll.u32 %s213_s16, 4  ;;  %p1651_p11 = scmp.ne.s32.totalorder %s1941_s7, %s1650_s10  ;;  %s222_s20 = int_to_ptr.vmem [resolvable:$true] %s221_s20 }
  0x54   : > { %s1655_s22 = scalar_lea.hbm %s2112_s2, 256  ;;  %p1656_p5 = scmp.lt.u32.totalorder %s1941_s7, %s2112_s2 }
  0x55   : > { %p1653_p2 = pnand %p1651_p11, %p1896_p4  ;;  %p1657_p7 = scmp.lt.u32.totalorder %s1655_s22, %s1650_s10 }
  0x56   : > { %p1659_p12 = scmp.lt.u32.totalorder %s1650_s10, %s1941_s7 }
  0x57   : > { %p1654_p3 = pneg %p1653_p2  ;;  %p1658_p10 = por %p1657_p7, %p1656_p5 }
  0x59   : > { %p1660_p1 = por %p1659_p12, %p1658_p10 }
  0x5b   : > { %p1661_p8 = pnand %p1660_p1, %p1654_p3 }
  0x5d   : > { %1664 = shalt.err (!%p1661_p8)
}
  0x5e   : > { %s1665_s1 = scalar_lea.vmem %s222_s20, 128  ;;  %s1770_s29 = smov [#allocation10]  }
  0x5f   : > { %p1666_p9 = scmp.ne.s32.totalorder %s222_s20, %s1665_s1  ;;  %s1670_s5 = sshll.u32 %s1770_s29, 4  ;;  %s1671_s5 = int_to_ptr.vmem [resolvable:$false] %s1670_s5 }
  0x60   : > { %s1672_s23 = scalar_lea.vmem %s1671_s5, 256  ;;  %p1673_p11 = scmp.lt.s32.totalorder %s222_s20, %s1671_s5 }
  0x61   : > { %p1668_p6 = pnand %p1666_p9, %p1896_p4  ;;  %p1674_p2 = scmp.lt.s32.totalorder %s1672_s23, %s1665_s1 }
  0x63   : > { %p1669_p13 = pneg %p1668_p6  ;;  %p1675_p0 = por %p1674_p2, %p1673_p11 }
  0x65   : > { %p1676_p5 = pnand %p1675_p0, %p1669_p13 }
  0x67   : > { %1679 = shalt.err (!%p1676_p5)
}
  0x68   : > { %p2133_p7 = scmp.ne.s32.totalorder %s2127_s4, 0  ;;  %p2134_p3 = scmp.ne.s32.totalorder %s2132_s19, 0 }
  0x69   : > { %s1988_s21 = sand.u32 (!%p2134_p3), 1, %s1750_s13   ;;  %p2135_p0 = scmp.ne.s32.totalorder (!%p2134_p3), %s2123_s24, 0 }
  0x6a   : > { %1523 = dma.hbm_to_vmem [thread:$0]  (!%p2133_p7), %s1941_s7, 128, %s222_s20, %s1890_s11  }
  0x6b   : > { %230 = sbr.rel (%p2134_p3) target bundleno = 980 (0x3d4), region = 32  ;;  %s1991_s8 = sshll.u32 (!%p2134_p3), %s1988_s21, 3 }
  0x6c   : > { %s233_s26 = scalar_lea.sflag (!%p2134_p3), [#allocation6], %s1988_s21  ;;  %s236_s16 = scalar_lea.vmem (!%p2134_p3), [#allocation5], %s1991_s8 }
  0x72   : > { %1733 = dma.done.wait (%p2135_p0), %s233_s26, 128  }
  0x73   : > { %1735 = vsyncadd (%p2135_p0), %s233_s26, 4294967168  ;;  %s241_s4 = sand.u32 1, %s1827_s18   ;;  %s245_s19 = scalar_lea.vmem [#allocation8], %s1991_s8 }
  0x74   : > { %s242_s11 = scalar_lea.sflag [#allocation9], %s241_s4 }
  0x75   : > { %1737 = dma.done.wait (%p2135_p0), %s242_s11, 256  }
  0x76   : > { %1739 = vsyncadd (%p2135_p0), %s242_s11, 4294967040  ;;  %vm294_vm0 = vcmask 261120   ;;  %v1771_v0 = vmov 0.0   ;;  %vm1772_vm1 = vmmov 0   ;;  %v298_v1 = vld [vmem:[%s245_s19] sm:$0xff]  ;;  %v296_v2 = vld [vmem:[%s236_s16] sm:$0xff] }
  0x77   : > { %1436 = vmatprep.subr.mxu0 %v1771_v0  ;;  %295 = vst.msk [vmem:[#allocation4] sm:$0xff] %vm294_vm0, %v1771_v0  ;;  %1438 = vmatprep.mubr.msk.f32.mxu0 %vm1772_vm1, %v1771_v0  ;;  %v304_v3 = vsel %vm294_vm0, %v298_v1, 0  ;;  %v297_v4 = vmul.f32 0.17677669, %v296_v2  ;;  %vm291_vm2 = vcmask 7168   ;;  %v1773_v16 = vmov -inf  }
  0x78   : > { %1466 = vmatprep.subr.mxu1 %v1771_v0  ;;  %1468 = vmatprep.mubr.msk.f32.mxu1 %vm1772_vm1, %v1771_v0  ;;  %v307_v5 = vand.u32 4294901760, %v304_v3  ;;  %292 = vst.msk [vmem:[#allocation2] sm:$0xff] %vm291_vm2, %v1773_v16  ;;  %293 = vst.msk [vmem:[#allocation3] sm:$0xff] %vm291_vm2, %v1771_v0  ;;  %vm753_vm3 = vcmask 64512   ;;  %v1774_v20 = vmov 0   ;;  %s254_s18 = scalar_lea.vmem [#allocation10], %s1991_s8 }
  0x79   : > { %v301_v6 = vsel %vm294_vm0, %v297_v4, 0  ;;  %1582 = vset.pattern.permute.xlu0 %v1774_v20  ;;  %1583 = vset.pattern.permute.xlu1 %v1774_v20  ;;  %v784_v25 = vld [vmem:[%s254_s18] sm:$0xff]  ;;  %s1409_s24 = sshll.u32 %s1758_s15, 7  ;;  %s286_s7 = scalar_lea.vmem [#allocation11], %s1991_s8 }
  0x7a   : > { %1437 = vmatpush3.xpose.msra.mxu0 %v307_v5  ;;  %v384_v7 = vsub.f32 %v304_v3, %v307_v5  ;;  %v372_v8 = vand.u32 4294901760, %v301_v6  ;;  %v789_v26 = vand.u32 4294901760, %v784_v25  ;;  %s1265_s20 = sshll.u32 %s286_s7, 4  ;;  %s2060_s9 = scalar_lea.hbm %s2113_s3, %s1409_s24  ;;  %s2062_s20 = int_to_ptr.vmem [resolvable:$true] %s1265_s20 }
  0x7b   : > { %1441 = vmatprep.subr.mxu0 %v1771_v0  ;;  %s1251_s22 = scalar_lea.sflag [#allocation7], %s1988_s21  ;;  %s1680_s28 = scalar_lea.vmem %s2062_s20, 128 }
  0x7c   : > { %v373_v9 = vsub.f32 %v301_v6, %v372_v8  ;;  %v385_v10 = vand.u32 4294901760, %v384_v7  ;;  %1467 = vmatpush3.msra.mxu1 %v789_v26  ;;  %v866_v30 = vsub.f32 %v784_v25, %v789_v26  ;;  %p1681_p4 = scmp.ne.s32.totalorder %s2062_s20, %s1680_s28  ;;  %p2136_p10 = scmp.ne.s32.totalorder %s2124_s25, 0 }
  0x7d   : > { %1471 = vmatprep.subr.mxu1 %v1771_v0  ;;  %s1775_s15 = smov [#allocation11]  }
  0x7e   : > { %v374_v11 = vand.u32 4294901760, %v373_v9  ;;  %v386_v12 = vsub.f32 %v384_v7, %v385_v10  ;;  %v867_v34 = vand.u32 4294901760, %v866_v30  ;;  %v777_v63 = vld [vmem:[#allocation4] sm:$0xff]  ;;  %p1682_p12 = pnand %p1681_p4, %p2136_p10  ;;  %s1684_s30 = sshll.u32 %s1775_s15, 4  ;;  %s1685_s30 = int_to_ptr.vmem [resolvable:$false] %s1684_s30 }
  0x7f   : > { %v752_v21 = vld [vmem:[#allocation2] sm:$0xff]  ;;  %v769_v44 = vld [vmem:[#allocation3] sm:$0xff]  ;;  %s1686_s1 = scalar_lea.vmem %s1685_s30, 256  ;;  %p1687_p8 = scmp.lt.s32.totalorder %s2062_s20, %s1685_s30 }
  0x80   : > { %v375_v13 = vsub.f32 %v373_v9, %v374_v11  ;;  %v387_v14 = vand.u32 4294901760, %v386_v12  ;;  %v868_v38 = vsub.f32 %v866_v30, %v867_v34  ;;  %p1683_p1 = pneg %p1682_p12  ;;  %p1688_p9 = scmp.lt.s32.totalorder %s1686_s1, %s1680_s28 }
  0x82   : > { %v376_v15 = vand.u32 4294901760, %v375_v13  ;;  %v869_v41 = vand.u32 4294901760, %v868_v38  ;;  %p1689_p6 = por %p1688_p9, %p1687_p8 }
  0x84   : > { %1439 = vmatmul.mubr.f32.vlgmr.msra.gmra.mrb[0].mxu0 %v376_v15  ;;  %p1690_p13 = pnand %p1689_p6, %p1683_p1 }
  0x85   : > { %1442 = vmatpush3.xpose.msra.mxu0 %v387_v14  ;;  %1443 = vmatprep.mubr.msk.f32.mxu0 %vm1772_vm1, %v1771_v0 }
  0x86   : > { %1446 = vmatprep.subr.mxu0 %v1771_v0 }
  0x8c   : > { %1444 = vmatmul.mubr.f32.vlgmr.msra.gmra.mrb[0].mxu0 %v372_v8 }
  0x8d   : > { %1447 = vmatpush3.xpose.msra.mxu0 %v384_v7  ;;  %1448 = vmatprep.mubr.msk.f32.mxu0 %vm1772_vm1, %v1771_v0 }
  0x8e   : > { %1451 = vmatprep.subr.mxu0 %v1771_v0 }
  0x94   : > { %1449 = vmatmul.mubr.f32.vlgmr.msra.gmra.mrb[0].mxu0 %v373_v9 }
  0x95   : > { %1452 = vmatpush3.xpose.msra.mxu0 %v307_v5  ;;  %1453 = vmatprep.mubr.msk.f32.mxu0 %vm1772_vm1, %v1771_v0 }
  0x96   : > { %1456 = vmatprep.subr.mxu0 %v1771_v0 }
  0x9c   : > { %1454 = vmatmul.mubr.f32.vlgmr.msra.gmra.mrb[0].mxu0 %v374_v11 }
  0x9d   : > { %1457 = vmatpush3.xpose.msra.mxu0 %v385_v10  ;;  %1458 = vmatprep.mubr.msk.f32.mxu0 %vm1772_vm1, %v1771_v0 }
  0x9e   : > { %1461 = vmatprep.subr.mxu0 %v1771_v0 }
  0xa4   : > { %1459 = vmatmul.mubr.f32.vlgmr.msra.gmra.mrb[0].mxu0 %v372_v8 }
  0xa5   : > { %1462 = vmatpush3.xpose.msra.mxu0 %v307_v5  ;;  %1463 = vmatprep.mubr.msk.f32.mxu0 %vm1772_vm1, %v1771_v0 }
  0xac   : > { %1464 = vmatmul.mubr.f32.vlgmr.msra.gmra.mrb[0].mxu0 %v372_v8 }
 0x17f   : > { %v748_v17 = vpop.f32.mrb[0].mxu0 }
 0x180   : > { %v1465_v18 = vpop.f32.mrb[1].mxu0  ;;  %v754_v19 = vsel %vm753_vm3, %v748_v17, -inf }
 0x181   : > { %755 = vmax.xlane.f32.xlu0 %v754_v19 }
 0x20e   : > { %v756_v22 = vpop.xlane.xlu0 %755 }
 0x20f   : > { %v757_v23 = vmax.f32 %v752_v21, %v756_v22 }
 0x211   : > { %v758_v24 = vsub.f32 %v752_v21, %v757_v23  ;;  %1236 = vst.msk [vmem:[#allocation2] sm:$0xff] %vm291_vm2, %v757_v23  ;;  %763 = vperm.xlu0 %1582, %v757_v23  }
 0x213   : > { %v759_v36 = vmul.f32 1.442695, %v758_v24 }
 0x290   : > { %v764_v27 = vpop.permute.xlu0 %763 }
 0x291   : > { %v766_v28 = vsub.f32 %v748_v17, %v764_v27 }
 0x293   : > { %v767_v29 = vmul.f32 1.442695, %v766_v28 }
 0x295   : > { %1584 = vpow2.f32 %v767_v29 }
 0x296   : > { %1586 = vpow2.f32 %v759_v36 }
 0x29f   : > { %v1585_v31 = vpop.eup %1584 }
 0x2a0   : > { %v771_v32 = vsel %vm753_vm3, %v1585_v31, 0.0  ;;  %v786_v33 = vsel %vm753_vm3, %v1585_v31, 0  ;;  %v1587_v43 = vpop.eup %1586 }
 0x2a1   : > { %772 = vadd.xlane.f32.xlu1 %v771_v32  ;;  %v854_v35 = vand.u32 4294901760, %v786_v33  ;;  %v770_v45 = vmul.f32 %v1587_v43, %v769_v44 }
 0x2a3   : > { %v855_v37 = vsub.f32 %v786_v33, %v854_v35 }
 0x2a5   : > { %v856_v39 = vand.u32 4294901760, %v855_v37 }
 0x2a7   : > { %v857_v40 = vsub.f32 %v855_v37, %v856_v39 }
 0x2a9   : > { %v858_v42 = vand.u32 4294901760, %v857_v40 }
 0x2ab   : > { %1469 = vmatmul.mubr.f32.vlgmr.msra.gmra.mrb[0].mxu1 %v858_v42 }
 0x2ac   : > { %1472 = vmatpush3.msra.mxu1 %v869_v41  ;;  %1473 = vmatprep.mubr.msk.f32.mxu1 %vm1772_vm1, %v1771_v0 }
 0x2ad   : > { %1476 = vmatprep.subr.mxu1 %v1771_v0 }
 0x2af   : > { %1474 = vmatmul.mubr.f32.vlgmr.msra.gmra.mrb[2].mxu1 %v854_v35 }
 0x2b0   : > { %1477 = vmatpush3.msra.mxu1 %v866_v30  ;;  %1478 = vmatprep.mubr.msk.f32.mxu1 %vm1772_vm1, %v1771_v0 }
 0x2b1   : > { %1481 = vmatprep.subr.mxu1 %v1771_v0 }
 0x2b2   : > { %780 = vperm.xlu1 %1583, %v1587_v43  }
 0x2b3   : > { %1479 = vmatmul.mubr.f32.vlgmr.msra.gmra.mrb[4].mxu1 %v855_v37 }
 0x2b4   : > { %1482 = vmatpush3.msra.mxu1 %v789_v26  ;;  %1483 = vmatprep.mubr.msk.f32.mxu1 %vm1772_vm1, %v1771_v0 }
 0x2b5   : > { %1486 = vmatprep.subr.mxu1 %v1771_v0 }
 0x2b7   : > { %1484 = vmatmul.mubr.f32.vlgmr.msra.gmra.mrb[6].mxu1 %v856_v39 }
 0x2b8   : > { %1487 = vmatpush3.msra.mxu1 %v867_v34  ;;  %1488 = vmatprep.mubr.msk.f32.mxu1 %vm1772_vm1, %v1771_v0 }
 0x2b9   : > { %1491 = vmatprep.subr.mxu1 %v1771_v0 }
 0x2bb   : > { %1489 = vmatmul.mubr.f32.vlgmr.msra.gmra.mrb[8].mxu1 %v854_v35 }
 0x2bc   : > { %1492 = vmatpush3.msra.mxu1 %v789_v26  ;;  %1493 = vmatprep.mubr.msk.f32.mxu1 %vm1772_vm1, %v1771_v0 }
 0x2bf   : > { %1494 = vmatmul.mubr.f32.vlgmr.msra.gmra.mrb[10].mxu1 %v854_v35 }
 0x32e   : > { %v773_v46 = vpop.xlane.xlu1 %772 }
 0x32f   : > { %v774_v47 = vadd.f32 %v773_v46, %v770_v45 }
 0x331   : > { %776 = vst.msk [vmem:[#allocation3] sm:$0xff] %vm291_vm2, %v774_v47 }
 0x332   : > { %v781_v0 = vpop.permute.xlu1 %780 }
 0x333   : > { %v783_v2 = vmul.f32 %v781_v0, %v777_v63 }
 0x338   : > { %v1241_v48 = vld [vmem:[#allocation3] sm:$0xff] }
 0x339   : > { %1244 = vperm.xlu1 %1583, %v1241_v48  }
 0x37e   : > { %v860_v49 = vpop.f32.mrb[0].mxu1 }
 0x37f   : > { %v1470_v50 = vpop.f32.mrb[1].mxu1 }
 0x382   : > { %v936_v51 = vpop.f32.mrb[2].mxu1 }
 0x383   : > { %v937_v52 = vadd.f32 %v936_v51, %v860_v49  ;;  %v1475_v53 = vpop.f32.mrb[3].mxu1 }
 0x386   : > { %v1010_v54 = vpop.f32.mrb[4].mxu1 }
 0x387   : > { %v1011_v55 = vadd.f32 %v1010_v54, %v937_v52  ;;  %v1480_v56 = vpop.f32.mrb[5].mxu1 }
 0x38a   : > { %v1084_v57 = vpop.f32.mrb[6].mxu1 }
 0x38b   : > { %v1085_v58 = vadd.f32 %v1084_v57, %v1011_v55  ;;  %v1485_v59 = vpop.f32.mrb[7].mxu1 }
 0x38e   : > { %v1158_v60 = vpop.f32.mrb[8].mxu1 }
 0x38f   : > { %v1159_v61 = vadd.f32 %v1158_v60, %v1085_v58  ;;  %v1490_v62 = vpop.f32.mrb[9].mxu1 }
 0x392   : > { %v1230_v1 = vpop.f32.mrb[10].mxu1 }
 0x393   : > { %v1231_v3 = vadd.f32 %v1230_v1, %v1159_v61  ;;  %v1495_v4 = vpop.f32.mrb[11].mxu1 }
 0x395   : > { %v1234_v5 = vadd.f32 %v1231_v3, %v783_v2 }
 0x397   : > { %1235 = vst.msk [vmem:[#allocation4] sm:$0xff] %vm294_vm0, %v1234_v5 }
 0x39e   : > { %v1240_v8 = vld [vmem:[#allocation4] sm:$0xff] }
 0x3b8   : > { %v1245_v6 = vpop.permute.xlu1 %1244 }
 0x3b9   : > { %1588 = vrcp.f32 %v1245_v6 }
 0x3c3   : > { %v1589_v7 = vpop.eup %1588 }
 0x3c4   : > { %v1248_v9 = vmul.f32 %v1589_v7, %v1240_v8 }
 0x3c6   : > { %1249 = vst.msk [vmem:[%s286_s7] sm:$0xff] %vm294_vm0, %v1248_v9 }
 0x3c7   : > { %1693 = shalt.err (!%p1690_p13)
}
 0x3c8   : > { %s1694_s29 = scalar_lea.hbm %s2060_s9, 128  ;;  %s1698_s21 = scalar_lea.hbm %s2113_s3, 256 }
 0x3c9   : > { %p1695_p11 = scmp.ne.s32.totalorder %s2060_s9, %s1694_s29  ;;  %p1699_p7 = scmp.lt.u32.totalorder %s2060_s9, %s2113_s3 }
 0x3ca   : > { %p1700_p3 = scmp.lt.u32.totalorder %s1698_s21, %s1694_s29  ;;  %p1702_p4 = scmp.lt.u32.totalorder %s1694_s29, %s2060_s9 }
 0x3cb   : > { %p1696_p2 = pnand %p1695_p11, %p2136_p10 }
 0x3cc   : > { %p1701_p0 = por %p1700_p3, %p1699_p7 }
 0x3cd   : > { %p1697_p5 = pneg %p1696_p2 }
 0x3ce   : > { %p1703_p12 = por %p1702_p4, %p1701_p0 }
 0x3d0   : > { %p1704_p1 = pnand %p1703_p12, %p1697_p5 }
 0x3d2   : > { %1707 = shalt.err (!%p1704_p1)
}
 0x3d3   : > { %1512 = dma.vmem_to_hbm [thread:$0]  (%p2136_p10), %s2062_s20, 128, %s2060_s9, %s1251_s22  }
 0x3d4 PF: > { %s1277_s16 = sand.u32 1, %s1746_s12   ;;  %p2137_p8 = scmp.ne.s32.totalorder %s2126_s27, 0 }
 0x3d5   : > { %p2138_p9 = scmp.ge.s32.totalorder %s1766_s17, 2  ;;  %s1278_s4 = scalar_lea.sflag [#allocation7], %s1277_s16 }
 0x3d7   : > { %p1525_p6 = pnand %p2138_p9, %p2137_p8 }
 0x3d9   : > { %1741 = dma.done.wait (!%p1525_p6), %s1278_s4, 128  }
 0x3da   : > { %1743 = vsyncadd (!%p1525_p6), %s1278_s4, 4294967168  ;;  %s22_s17 = sadd.s32 1, %s1766_s17   ;;  %s2139_s25 = sld [smem:[#allocation17_spill]] }
 0x3db   : > { %p19_p13 = scmp.ge.s32.totalorder %s22_s17, 4   ;;  %s2140_s15 = sld [smem:[#allocation15_spill]] }
 0x3dc   : > { %s2141_s16 = sld [smem:[#allocation16_spill]]  ;;  %s2142_s12 = smov %s1750_s13 }
 0x3dd   : > { %s2143_s13 = smov %s1754_s14  ;;  %21 = sbr.rel (!%p19_p13) target bundleno = 10 (0xa), region = 109 }
 0x3e0   : > { %s2144_s14 = smov %s2139_s25 }
 0x3e4   :  { %1283 = vsyncpa [#allocation6], 1 }
 0x3e5   :  { %1285 = vsyncpa [#allocation6 + $0x1], 1 }
 0x3e6   :  { %1286 = vsyncpa [#allocation9], 1 }
 0x3e7   :  { %1288 = vsyncpa [#allocation9 + $0x1], 1 }
 0x3e8   :  { %1289 = vsyncpa [#allocation7], 1 }
 0x3e9   :  { %1291 = vsyncpa [#allocation7 + $0x1], 1 }

</bundles_post_ra>
